<compile_context>
chip_gen: v6e
topology: v6e:2x2x1
jax: 0.10.0
libtpu: 0.0.40
codegen_flags: <defaults>
</compile_context>

<pallas_src>
import functools

import jax
import jax.numpy as jnp
from jax.experimental import pallas as pl
from jax.experimental.pallas import tpu as pltpu


# ------------------------------ Pallas kernel -------------------------------


def _multigcn_kernel(x_ref, adj_ref, w_ref, b_ref, o_ref, *,
                     num_layers, edge_types, f_in0, f_out, matmul_dtype):
    # x_ref  : (B*N, F_in0)              f32
    # adj_ref: (E, B*N, B*N)             matmul_dtype (block-diagonal over batch)
    # w_ref  : (L, F_max, (E+1)*F_out)   matmul_dtype ([W_0|..|W_{E-1}|W2], row-padded)
    # b_ref  : (L, 1, (E+1)*F_out)       f32          ([b_0|..|b_{E-1}|b2])
    # o_ref  : (B*N, F_out)              f32
    adj = adj_ref[...]                       # layer-invariant: load + (pre-)cast once
    h = x_ref[...].astype(jnp.float32)       # stays resident in vregs/VMEM across layers

    for l in range(num_layers):              # unrolled at trace time (small L)
        f_in = f_in0 if l == 0 else f_out
        w = w_ref[l, :f_in, :]               # (f_in, (E+1)*F_out), static slice
        b = b_ref[l]                         # (1, (E+1)*F_out)

        # One wide, lane-dense matmul: all E edge Linears + linear_2 together.
        hcat = jnp.dot(h.astype(matmul_dtype), w,
                       preferred_element_type=jnp.float32) + b

        # Seed the accumulator with the linear_2 block (no zero-fill needed),
        # then accumulate the propagated per-edge blocks.
        acc = hcat[:, edge_types * f_out:]
        for e in range(edge_types):          # unrolled (small E)
            he = hcat[:, e * f_out:(e + 1) * f_out].astype(matmul_dtype)
            acc = acc + jnp.dot(adj[e], he, preferred_element_type=jnp.float32)

        h = jnp.tanh(acc)                    # bias/tanh epilogue stays f32

    o_ref[...] = h.astype(o_ref.dtype)


# ------------------------------- wrapper -------------------------------------


def multigcn_forward(params, x, adj, *, matmul_dtype=jnp.float32):
    """Fused MultiGCN forward. params: list of per-layer dicts (w_adj, b_adj, w2, b2)."""
    B, N, f_in0 = x.shape
    E = adj.shape[1]
    L = len(params)
    f_out = params[-1]["w2"].shape[1]
    f_max = max(f_in0, f_out)

    # ---- pack weights once, wrapper-side (zero runtime cost in the kernel) ----
    w_all, b_all = [], []
    for layer in params:
        w_cat = jnp.concatenate(
            [layer["w_adj"][e] for e in range(E)] + [layer["w2"]], axis=-1)
        b_cat = jnp.concatenate(
            [layer["b_adj"][e] for e in range(E)] + [layer["b2"]], axis=-1)
        if w_cat.shape[0] < f_max:                           # row-pad layer 0
            w_cat = jnp.pad(w_cat, ((0, f_max - w_cat.shape[0]), (0, 0)))
        w_all.append(w_cat)
        b_all.append(b_cat)
    w_all = jnp.stack(w_all).astype(matmul_dtype)            # (L, f_max, (E+1)*f_out)
    b_all = jnp.stack(b_all).astype(jnp.float32)             # (L, 1,    (E+1)*f_out)

    # ---- fold batch into matmul rows; block-diagonal adjacency over batch ----
    x2 = x.reshape(B * N, f_in0)
    adj_t = jnp.transpose(adj, (1, 0, 2, 3))                 # (E, B, N, N)
    adj_blk = jnp.zeros((E, B * N, B * N), jnp.float32)
    for b in range(B):
        adj_blk = adj_blk.at[:, b * N:(b + 1) * N, b * N:(b + 1) * N].set(adj_t[:, b])
    adj_blk = adj_blk.astype(matmul_dtype)                   # cast once at the boundary
    # TODO(synk): for large B or N, tile the adjacency contraction over a grid axis
    # (instead of block-diagonalizing) and set vmem_limit_bytes explicitly (v7x VMEM).

    kernel = functools.partial(
        _multigcn_kernel, num_layers=L, edge_types=E,
        f_in0=f_in0, f_out=f_out, matmul_dtype=matmul_dtype)

    vmem = pl.BlockSpec(memory_space=pltpu.MemorySpace.VMEM)
    out = pl.pallas_call(
        kernel,
        out_shape=jax.ShapeDtypeStruct((B * N, f_out), jnp.float32),
        in_specs=[vmem, vmem, vmem, vmem],
        out_specs=vmem,
    )(x2, adj_blk, w_all, b_all)
    return out.reshape(B, N, f_out)


# ----------------------------- parameter setup ------------------------------


def init_params(key, in_features, out_features, num_edge_types, num_layers):
    scale = 0.1
    params = []
    keys = jax.random.split(key, num_layers)
    for i in range(num_layers):
        f_in = in_features if i == 0 else out_features
        lk = jax.random.split(keys[i], 4)
        params.append({
            "w_adj": scale * jax.random.normal(lk[0], (num_edge_types, f_in, out_features), jnp.float32),
            "b_adj": scale * jax.random.normal(lk[1], (num_edge_types, 1, out_features), jnp.float32),
            "w2":    scale * jax.random.normal(lk[2], (f_in, out_features), jnp.float32),
            "b2":    scale * jax.random.normal(lk[3], (1, out_features), jnp.float32),
        })
    return params


# ------------------------------ pure-JAX reference ---------------------------


def multigcn_reference(params, x, adj, *, matmul_dtype=jnp.float32):
    """Mirrors the PyTorch MultiGCN forward (dropout = identity in eval mode)."""
    h = x
    for layer in params:
        hm = h.astype(matmul_dtype)
        hs = jnp.einsum("bnf,efo->beno", hm, layer["w_adj"].astype(matmul_dtype),
                        preferred_element_type=jnp.float32) + layer["b_adj"][None]
        prop = jnp.einsum("bemn,beno->bemo", adj.astype(matmul_dtype),
                          hs.astype(matmul_dtype),
                          preferred_element_type=jnp.float32)
        out_sum = prop.sum(axis=1)
        lin2 = jnp.dot(hm, layer["w2"].astype(matmul_dtype),
                       preferred_element_type=jnp.float32) + layer["b2"]
        h = jnp.tanh(out_sum + lin2)
    return h


# ------------------------------------ main -----------------------------------


if __name__ == "__main__":
    B = 2               # batch
    N = 8               # graph nodes
    in_features = 16
    out_features = 32
    num_edge_types = 3
    num_layers = 3

    key = jax.random.PRNGKey(0)
    k_param, k_x, k_adj = jax.random.split(key, 3)

    params = init_params(k_param, in_features, out_features, num_edge_types, num_layers)
    x = jax.random.normal(k_x, (B, N, in_features), jnp.float32)
    adj = jax.random.uniform(k_adj, (B, num_edge_types, N, N), jnp.float32)

    # f32 path: exact semantics of the PyTorch module.
    out = multigcn_forward(params, x, adj, matmul_dtype=jnp.float32)
    out = jax.block_until_ready(out)
    ref = multigcn_reference(params, x, adj, matmul_dtype=jnp.float32)
    assert out.shape == (B, N, out_features)
    assert jnp.allclose(out, ref, atol=2e-5, rtol=2e-5), "f32 mismatch vs reference"

    # bf16-operand path (v6e/v7x MXU-friendly): bf16 matmul operands, f32 accumulate + tanh.
    out_bf16 = multigcn_forward(params, x, adj, matmul_dtype=jnp.bfloat16)
    out_bf16 = jax.block_until_ready(out_bf16)
    ref_bf16 = multigcn_reference(params, x, adj, matmul_dtype=jnp.bfloat16)
    assert out_bf16.shape == (B, N, out_features)
    assert jnp.allclose(out_bf16, ref_bf16, atol=2e-2, rtol=2e-2), "bf16 mismatch vs reference"

    # TODO(synk): nn.Dropout is inference-mode identity here; training-mode dropout omitted.
    print("KERNEL_OK")
</pallas_src>

<mosaic_0001>
module attributes {stable_mosaic.version = 11 : i64} {
  func.func @_multigcn_kernel(%arg0: memref<16x16xf32, #tpu.memory_space<vmem>>, %arg1: memref<3x16x16xf32, #tpu.memory_space<vmem>>, %arg2: memref<3x32x128xf32, #tpu.memory_space<vmem>>, %arg3: memref<3x1x128xf32, #tpu.memory_space<vmem>>, %arg4: memref<16x32xf32, #tpu.memory_space<vmem>>) attributes {dimension_semantics = [], scalar_prefetch = 0 : i64, scratch_operands = 0 : i64, tpu.core_type = #tpu.core_type<tc>} {
    %c0 = arith.constant 0 : index
    %c0_0 = arith.constant 0 : index
    %c0_1 = arith.constant 0 : index
    %0 = vector.load %arg1[%c0, %c0_0, %c0_1] : memref<3x16x16xf32, #tpu.memory_space<vmem>>, vector<3x16x16xf32>
    %c0_2 = arith.constant 0 : index
    %c0_3 = arith.constant 0 : index
    %1 = vector.load %arg0[%c0_2, %c0_3] : memref<16x16xf32, #tpu.memory_space<vmem>>, vector<16x16xf32>
    %c0_4 = arith.constant 0 : index
    %c0_5 = arith.constant 0 : index
    %c0_6 = arith.constant 0 : index
    %2 = vector.load %arg2[%c0_4, %c0_5, %c0_6] : memref<3x32x128xf32, #tpu.memory_space<vmem>>, vector<1x16x128xf32>
    %3 = vector.shape_cast %2 : vector<1x16x128xf32> to vector<16x128xf32>
    %c0_7 = arith.constant 0 : index
    %c0_8 = arith.constant 0 : index
    %c0_9 = arith.constant 0 : index
    %4 = vector.load %arg3[%c0_7, %c0_8, %c0_9] : memref<3x1x128xf32, #tpu.memory_space<vmem>>, vector<1x1x128xf32>
    %5 = vector.shape_cast %4 : vector<1x1x128xf32> to vector<1x128xf32>
    %cst = arith.constant dense<0.000000e+00> : vector<16x128xf32>
    %6 = tpu.matmul %1, %3, %cst {dimension_numbers = #tpu.dot_dimension_numbers<[1], [0], [0], [1], [0, 0, 1, 1], [], []>} : vector<16x16xf32>, vector<16x128xf32>, vector<16x128xf32> -> vector<16x128xf32>
    %7 = vector.broadcast %5 : vector<1x128xf32> to vector<16x128xf32>
    %8 = arith.addf %6, %7 : vector<16x128xf32>
    %9 = vector.extract_strided_slice %8 {offsets = [0, 96], sizes = [16, 32], strides = [1, 1]} : vector<16x128xf32> to vector<16x32xf32>
    %10 = vector.extract_strided_slice %8 {offsets = [0, 0], sizes = [16, 32], strides = [1, 1]} : vector<16x128xf32> to vector<16x32xf32>
    %11 = vector.extract_strided_slice %0 {offsets = [0, 0, 0], sizes = [1, 16, 16], strides = [1, 1, 1]} : vector<3x16x16xf32> to vector<1x16x16xf32>
    %12 = vector.shape_cast %11 : vector<1x16x16xf32> to vector<16x16xf32>
    %cst_10 = arith.constant dense<0.000000e+00> : vector<16x32xf32>
    %13 = tpu.matmul %12, %10, %cst_10 {dimension_numbers = #tpu.dot_dimension_numbers<[1], [0], [0], [1], [0, 0, 1, 1], [], []>} : vector<16x16xf32>, vector<16x32xf32>, vector<16x32xf32> -> vector<16x32xf32>
    %14 = arith.addf %9, %13 : vector<16x32xf32>
    %15 = vector.extract_strided_slice %8 {offsets = [0, 32], sizes = [16, 32], strides = [1, 1]} : vector<16x128xf32> to vector<16x32xf32>
    %16 = vector.extract_strided_slice %0 {offsets = [1, 0, 0], sizes = [1, 16, 16], strides = [1, 1, 1]} : vector<3x16x16xf32> to vector<1x16x16xf32>
    %17 = vector.shape_cast %16 : vector<1x16x16xf32> to vector<16x16xf32>
    %cst_11 = arith.constant dense<0.000000e+00> : vector<16x32xf32>
    %18 = tpu.matmul %17, %15, %cst_11 {dimension_numbers = #tpu.dot_dimension_numbers<[1], [0], [0], [1], [0, 0, 1, 1], [], []>} : vector<16x16xf32>, vector<16x32xf32>, vector<16x32xf32> -> vector<16x32xf32>
    %19 = arith.addf %14, %18 : vector<16x32xf32>
    %20 = vector.extract_strided_slice %8 {offsets = [0, 64], sizes = [16, 32], strides = [1, 1]} : vector<16x128xf32> to vector<16x32xf32>
    %21 = vector.extract_strided_slice %0 {offsets = [2, 0, 0], sizes = [1, 16, 16], strides = [1, 1, 1]} : vector<3x16x16xf32> to vector<1x16x16xf32>
    %22 = vector.shape_cast %21 : vector<1x16x16xf32> to vector<16x16xf32>
    %cst_12 = arith.constant dense<0.000000e+00> : vector<16x32xf32>
    %23 = tpu.matmul %22, %20, %cst_12 {dimension_numbers = #tpu.dot_dimension_numbers<[1], [0], [0], [1], [0, 0, 1, 1], [], []>} : vector<16x16xf32>, vector<16x32xf32>, vector<16x32xf32> -> vector<16x32xf32>
    %24 = arith.addf %19, %23 : vector<16x32xf32>
    %25 = math.tanh %24 : vector<16x32xf32>
    %c1 = arith.constant 1 : index
    %c0_13 = arith.constant 0 : index
    %c0_14 = arith.constant 0 : index
    %26 = vector.load %arg2[%c1, %c0_13, %c0_14] : memref<3x32x128xf32, #tpu.memory_space<vmem>>, vector<1x32x128xf32>
    %27 = vector.shape_cast %26 : vector<1x32x128xf32> to vector<32x128xf32>
    %c1_15 = arith.constant 1 : index
    %c0_16 = arith.constant 0 : index
    %c0_17 = arith.constant 0 : index
    %28 = vector.load %arg3[%c1_15, %c0_16, %c0_17] : memref<3x1x128xf32, #tpu.memory_space<vmem>>, vector<1x1x128xf32>
    %29 = vector.shape_cast %28 : vector<1x1x128xf32> to vector<1x128xf32>
    %cst_18 = arith.constant dense<0.000000e+00> : vector<16x128xf32>
    %30 = tpu.matmul %25, %27, %cst_18 {dimension_numbers = #tpu.dot_dimension_numbers<[1], [0], [0], [1], [0, 0, 1, 1], [], []>} : vector<16x32xf32>, vector<32x128xf32>, vector<16x128xf32> -> vector<16x128xf32>
    %31 = vector.broadcast %29 : vector<1x128xf32> to vector<16x128xf32>
    %32 = arith.addf %30, %31 : vector<16x128xf32>
    %33 = vector.extract_strided_slice %32 {offsets = [0, 96], sizes = [16, 32], strides = [1, 1]} : vector<16x128xf32> to vector<16x32xf32>
    %34 = vector.extract_strided_slice %32 {offsets = [0, 0], sizes = [16, 32], strides = [1, 1]} : vector<16x128xf32> to vector<16x32xf32>
    %35 = vector.extract_strided_slice %0 {offsets = [0, 0, 0], sizes = [1, 16, 16], strides = [1, 1, 1]} : vector<3x16x16xf32> to vector<1x16x16xf32>
    %36 = vector.shape_cast %35 : vector<1x16x16xf32> to vector<16x16xf32>
    %cst_19 = arith.constant dense<0.000000e+00> : vector<16x32xf32>
    %37 = tpu.matmul %36, %34, %cst_19 {dimension_numbers = #tpu.dot_dimension_numbers<[1], [0], [0], [1], [0, 0, 1, 1], [], []>} : vector<16x16xf32>, vector<16x32xf32>, vector<16x32xf32> -> vector<16x32xf32>
    %38 = arith.addf %33, %37 : vector<16x32xf32>
    %39 = vector.extract_strided_slice %32 {offsets = [0, 32], sizes = [16, 32], strides = [1, 1]} : vector<16x128xf32> to vector<16x32xf32>
    %40 = vector.extract_strided_slice %0 {offsets = [1, 0, 0], sizes = [1, 16, 16], strides = [1, 1, 1]} : vector<3x16x16xf32> to vector<1x16x16xf32>
    %41 = vector.shape_cast %40 : vector<1x16x16xf32> to vector<16x16xf32>
    %cst_20 = arith.constant dense<0.000000e+00> : vector<16x32xf32>
    %42 = tpu.matmul %41, %39, %cst_20 {dimension_numbers = #tpu.dot_dimension_numbers<[1], [0], [0], [1], [0, 0, 1, 1], [], []>} : vector<16x16xf32>, vector<16x32xf32>, vector<16x32xf32> -> vector<16x32xf32>
    %43 = arith.addf %38, %42 : vector<16x32xf32>
    %44 = vector.extract_strided_slice %32 {offsets = [0, 64], sizes = [16, 32], strides = [1, 1]} : vector<16x128xf32> to vector<16x32xf32>
    %45 = vector.extract_strided_slice %0 {offsets = [2, 0, 0], sizes = [1, 16, 16], strides = [1, 1, 1]} : vector<3x16x16xf32> to vector<1x16x16xf32>
    %46 = vector.shape_cast %45 : vector<1x16x16xf32> to vector<16x16xf32>
    %cst_21 = arith.constant dense<0.000000e+00> : vector<16x32xf32>
    %47 = tpu.matmul %46, %44, %cst_21 {dimension_numbers = #tpu.dot_dimension_numbers<[1], [0], [0], [1], [0, 0, 1, 1], [], []>} : vector<16x16xf32>, vector<16x32xf32>, vector<16x32xf32> -> vector<16x32xf32>
    %48 = arith.addf %43, %47 : vector<16x32xf32>
    %49 = math.tanh %48 : vector<16x32xf32>
    %c2 = arith.constant 2 : index
    %c0_22 = arith.constant 0 : index
    %c0_23 = arith.constant 0 : index
    %50 = vector.load %arg2[%c2, %c0_22, %c0_23] : memref<3x32x128xf32, #tpu.memory_space<vmem>>, vector<1x32x128xf32>
    %51 = vector.shape_cast %50 : vector<1x32x128xf32> to vector<32x128xf32>
    %c2_24 = arith.constant 2 : index
    %c0_25 = arith.constant 0 : index
    %c0_26 = arith.constant 0 : index
    %52 = vector.load %arg3[%c2_24, %c0_25, %c0_26] : memref<3x1x128xf32, #tpu.memory_space<vmem>>, vector<1x1x128xf32>
    %53 = vector.shape_cast %52 : vector<1x1x128xf32> to vector<1x128xf32>
    %cst_27 = arith.constant dense<0.000000e+00> : vector<16x128xf32>
    %54 = tpu.matmul %49, %51, %cst_27 {dimension_numbers = #tpu.dot_dimension_numbers<[1], [0], [0], [1], [0, 0, 1, 1], [], []>} : vector<16x32xf32>, vector<32x128xf32>, vector<16x128xf32> -> vector<16x128xf32>
    %55 = vector.broadcast %53 : vector<1x128xf32> to vector<16x128xf32>
    %56 = arith.addf %54, %55 : vector<16x128xf32>
    %57 = vector.extract_strided_slice %56 {offsets = [0, 96], sizes = [16, 32], strides = [1, 1]} : vector<16x128xf32> to vector<16x32xf32>
    %58 = vector.extract_strided_slice %56 {offsets = [0, 0], sizes = [16, 32], strides = [1, 1]} : vector<16x128xf32> to vector<16x32xf32>
    %59 = vector.extract_strided_slice %0 {offsets = [0, 0, 0], sizes = [1, 16, 16], strides = [1, 1, 1]} : vector<3x16x16xf32> to vector<1x16x16xf32>
    %60 = vector.shape_cast %59 : vector<1x16x16xf32> to vector<16x16xf32>
    %cst_28 = arith.constant dense<0.000000e+00> : vector<16x32xf32>
    %61 = tpu.matmul %60, %58, %cst_28 {dimension_numbers = #tpu.dot_dimension_numbers<[1], [0], [0], [1], [0, 0, 1, 1], [], []>} : vector<16x16xf32>, vector<16x32xf32>, vector<16x32xf32> -> vector<16x32xf32>
    %62 = arith.addf %57, %61 : vector<16x32xf32>
    %63 = vector.extract_strided_slice %56 {offsets = [0, 32], sizes = [16, 32], strides = [1, 1]} : vector<16x128xf32> to vector<16x32xf32>
    %64 = vector.extract_strided_slice %0 {offsets = [1, 0, 0], sizes = [1, 16, 16], strides = [1, 1, 1]} : vector<3x16x16xf32> to vector<1x16x16xf32>
    %65 = vector.shape_cast %64 : vector<1x16x16xf32> to vector<16x16xf32>
    %cst_29 = arith.constant dense<0.000000e+00> : vector<16x32xf32>
    %66 = tpu.matmul %65, %63, %cst_29 {dimension_numbers = #tpu.dot_dimension_numbers<[1], [0], [0], [1], [0, 0, 1, 1], [], []>} : vector<16x16xf32>, vector<16x32xf32>, vector<16x32xf32> -> vector<16x32xf32>
    %67 = arith.addf %62, %66 : vector<16x32xf32>
    %68 = vector.extract_strided_slice %56 {offsets = [0, 64], sizes = [16, 32], strides = [1, 1]} : vector<16x128xf32> to vector<16x32xf32>
    %69 = vector.extract_strided_slice %0 {offsets = [2, 0, 0], sizes = [1, 16, 16], strides = [1, 1, 1]} : vector<3x16x16xf32> to vector<1x16x16xf32>
    %70 = vector.shape_cast %69 : vector<1x16x16xf32> to vector<16x16xf32>
    %cst_30 = arith.constant dense<0.000000e+00> : vector<16x32xf32>
    %71 = tpu.matmul %70, %68, %cst_30 {dimension_numbers = #tpu.dot_dimension_numbers<[1], [0], [0], [1], [0, 0, 1, 1], [], []>} : vector<16x16xf32>, vector<16x32xf32>, vector<16x32xf32> -> vector<16x32xf32>
    %72 = arith.addf %67, %71 : vector<16x32xf32>
    %73 = math.tanh %72 : vector<16x32xf32>
    %c0_31 = arith.constant 0 : index
    %c0_32 = arith.constant 0 : index
    %74 = vector.load %arg4[%c0_31, %c0_32] : memref<16x32xf32, #tpu.memory_space<vmem>>, vector<16x32xf32>
    tpu.vector_store %arg4[%c0_31, %c0_32], %73 {strides = array<i32>} : memref<16x32xf32, #tpu.memory_space<vmem>>, vector<16x32xf32>,
    return
  }
}

</mosaic_0001>

<bundles_post_ra>
// kernel: tpu_custom_call.1
= control target key start
LH: loop header
LB: loop body
LE: loop exit
PB: predicated region body
PF: predicated region fallthrough
CT: control target
= control target key end

     0   :  { %9 = vsyncpa [#allocation3], 0  ;;  %s1653_s0 = inlined_call_operand.hbm [shape: f32[16,16], index: 0, kind: input, shape index: {}]   ;;  %s1654_s1 = inlined_call_operand.hbm [shape: f32[3,16,16], index: 1, kind: input, shape index: {}]   ;;  %s1655_s2 = inlined_call_operand.hbm [shape: f32[3,32,128], index: 2, kind: input, shape index: {}]   ;;  %s1656_s3 = inlined_call_operand.vmem [shape: f32[3,1,128], index: 3, kind: input, shape index: {}]   ;;  %s1657_s4 = inlined_call_operand.hbm [shape: f32[16,32], index: 4, kind: output, shape index: {}]  }
   0x1   :  { %10 = vsyncpa [#allocation6], 0 }
   0x2   :  { %11 = vsyncpa [#allocation4], 0  ;;  %s1494_s15 = smov [#allocation5]   ;;  %s1495_s17 = smov [#allocation2]  }
   0x3   :  { %s29_s16 = sshll.u32 %s1494_s15, 4  ;;  %s17_s18 = sshll.u32 %s1495_s17, 4  ;;  %s30_s16 = int_to_ptr.vmem [resolvable:$true] %s29_s16  ;;  %s18_s18 = int_to_ptr.vmem [resolvable:$true] %s17_s18 }
   0x4   :  { %s1416_s19 = scalar_lea.vmem %s30_s16, 768  ;;  %p1421_p1 = scmp.lt.s32.totalorder %s30_s16, %s30_s16 }
   0x5   :  { %p1417_p0 = scmp.ne.s32.totalorder %s30_s16, %s1416_s19  ;;  %p1422_p2 = scmp.lt.s32.totalorder %s1416_s19, %s1416_s19 }
   0x7   :  { %p1423_p3 = por %p1422_p2, %p1421_p1 }
   0x9   :  { %p1424_p4 = pnand %p1423_p3, %p1417_p0 }
   0xb   :  { %1427 = shalt.err (!%p1424_p4)
}
   0xc   :  { %s1496_s20 = smov 128   ;;  %s1497_s21 = smov 8  }
   0xd   :  { %35 = dma.hbm_to_vmem [thread:$0]  %s1654_s1, 768, %s30_s16, [#allocation6], %s1496_s20, %s1496_s20, %s1497_s21  }
   0xe   :  { %s1436_s24 = scalar_lea.vmem %s18_s18, 256  ;;  %p1441_p6 = scmp.lt.s32.totalorder %s18_s18, %s18_s18 }
   0xf   :  { %p1437_p5 = scmp.ne.s32.totalorder %s18_s18, %s1436_s24  ;;  %p1442_p7 = scmp.lt.s32.totalorder %s1436_s24, %s1436_s24 }
  0x11   :  { %p1443_p8 = por %p1442_p7, %p1441_p6 }
  0x13   :  { %p1444_p9 = pnand %p1443_p8, %p1437_p5 }
  0x15   :  { %1447 = shalt.err (!%p1444_p9)
}
  0x16   :  { %23 = dma.hbm_to_vmem [thread:$0]  %s1653_s0, 256, %s18_s18, [#allocation3], %s1496_s20, %s1496_s20, %s1497_s21  }
  0x17   :  { %s1498_s27 = smov [#allocation7]  }
  0x18   :  { %s41_s28 = sshll.u32 %s1498_s27, 4  ;;  %s42_s28 = int_to_ptr.vmem [resolvable:$true] %s41_s28 }
  0x19   :  { %s1456_s29 = scalar_lea.vmem %s42_s28, 1536  ;;  %p1461_p11 = scmp.lt.s32.totalorder %s42_s28, %s42_s28 }
  0x1a   :  { %p1457_p10 = scmp.ne.s32.totalorder %s42_s28, %s1456_s29  ;;  %p1462_p12 = scmp.lt.s32.totalorder %s1456_s29, %s1456_s29 }
  0x1c   :  { %p1463_p13 = por %p1462_p12, %p1461_p11 }
  0x1e   :  { %p1464_p0 = pnand %p1463_p13, %p1457_p10 }
  0x20   :  { %1467 = shalt.err (!%p1464_p0)
}
  0x21   :  { %47 = dma.hbm_to_vmem [thread:$0]  %s1655_s2, 1536, %s42_s28, [#allocation6], %s1496_s20, %s1496_s20, %s1497_s21  }
  0x22   :  { %1488 = dma.done.wait [#allocation3], 256  }
  0x23   :  { %1489 = vsyncadd [#allocation3], 4294967040 }
  0x24   :  { %1490 = dma.done.wait [#allocation6], 2304  }
  0x25   :  { %1491 = vsyncadd [#allocation6], 4294964992  ;;  %vm76_vm0 = vcmask 130048   ;;  %v68_v0 = vld [vmem:[#allocation7 + $0x8] sm:$0xff]  ;;  %v67_v1 = vld [vmem:[#allocation7] sm:$0xff]  ;;  %s1499_s5 = smov 64  }
  0x26   :  { %v65_v2 = vld [vmem:[#allocation2] sm:$0xff]  ;;  %1295 = vmatprep.subr.mxu0 %v68_v0  ;;  %v66_v3 = vld [vmem:[#allocation2 + $0x8] sm:$0xff]  ;;  %v1548_v4 = vld [vmem:[#allocation5] sm:$0xff]  ;;  %s1500_s6 = smov 96   ;;  %s1501_s7 = smov 32   ;;  %vm466_vm1 = vcmask 261120  }
  0x27   :  { %1299 = vmatprep.mubr.msk.f32.mxu0 %vm76_vm0, %v65_v2  ;;  %1296 = vmatpush3.msra.mxu0 %v68_v0  ;;  %v1552_v5 = vld [vmem:[#allocation5 + $0x10] sm:$0xff]  ;;  %v1561_v11 = vld [vmem:[#allocation5 + $0x8] sm:$0xff]  ;;  %v1563_v12 = vld [vmem:[#allocation5 + $0x20] sm:$0xff] }
  0x28   :  { %1297 = vmatprep.subr.mxu0 %v67_v1  ;;  %1306 = vmatprep.mubr.msk.f32.mxu1 %vm76_vm0, %v1548_v4  ;;  %v1214_v6 = vld [vmem:[%s1656_s3] ss:$0 sm:$0xff]  ;;  %v1571_v16 = vld [vmem:[#allocation5 + $0x28] sm:$0xff]  ;;  %v1573_v18 = vld [vmem:[#allocation5 + $0x18] sm:$0xff] }
  0x29   :  { %1298 = vmatpush3.msra.mxu0 %v67_v1  ;;  %v451_v25 = vld [vmem:[#allocation7 + $0x38] sm:$0xff]  ;;  %v450_v26 = vld [vmem:[#allocation7 + $0x30] sm:$0xff]  ;;  %v449_v27 = vld [vmem:[#allocation7 + $0x28] sm:$0xff] }
  0x2a   :  { %1300 = vmatmul.mubr.msk.f32.vlgmr.msra.gmra.mxu0 %vm76_vm0, %v66_v3  ;;  %v448_v40 = vld [vmem:[#allocation7 + $0x20] sm:$0xff]  ;;  %v821_v60 = vld [vmem:[#allocation7 + $0x58] sm:$0xff]  ;;  %v820_v61 = vld [vmem:[#allocation7 + $0x50] sm:$0xff] }
  0x2b   :  { %1313 = vmatprep.mubr.msk.f32.mxu0 %vm76_vm0, %v1552_v5  ;;  %v1224_v45 = vld [vmem:[%s1656_s3 + $0x1] ss:$0 sm:$0xff]  ;;  %v819_v62 = vld [vmem:[#allocation7 + $0x48] sm:$0xff] }
  0xea   :  { %v1301_v7 = vpop.f32.mrf.mxu0 }
  0xeb   :  { %v155_v8 = vadd.f32 %v1301_v7, %v1214_v6 }
  0xec   :  { %v149_v9 = vpop.f32.mrf.mxu0 }
  0xed   :  { %v150_v10 = vadd.f32 %v1214_v6, %v149_v9  ;;  %350 = vrot.lane.b32.xlu1 %v155_v8, %s1499_s5  ;;  %253 = vrot.lane.b32.xlu0 %v155_v8, %s1500_s6 }
  0xee   :  { %1302 = vmatprep.subr.mxu1 %v155_v8 }
  0xef   :  { %1303 = vmatpush3.msra.mxu1 %v155_v8 }
  0xf0   :  { %1304 = vmatprep.subr.mxu1 %v150_v10 }
  0xf1   :  { %1305 = vmatpush3.msra.mxu1 %v150_v10  ;;  %348 = vrot.lane.b32.xlu1 %v150_v10, %s1499_s5 }
  0xf2   :  { %251 = vrot.lane.b32.xlu0 %v150_v10, %s1500_s6  ;;  %1307 = vmatmul.mubr.msk.f32.vlgmr.msra.gmra.mxu1 %vm76_vm0, %v1561_v11 }
  0xf3   :  { %1320 = vmatprep.mubr.msk.f32.mxu1 %vm76_vm0, %v1563_v12 }
 0x15f   :  { %v351_v13 = vpop.permute.xlu1 %350  ;;  %v254_v14 = vpop.permute.xlu0 %253 }
 0x160   :  { %1309 = vmatprep.subr.mxu0 %v254_v14  ;;  %1316 = vmatprep.subr.mxu1 %v351_v13 }
 0x161   :  { %1310 = vmatpush3.msra.mxu0 %v254_v14  ;;  %1317 = vmatpush3.msra.mxu1 %v351_v13  ;;  %v818_v14 = vld [vmem:[#allocation7 + $0x40] sm:$0xff] }
 0x163   :  { %v349_v15 = vpop.permute.xlu1 %348 }
 0x164   :  { %v252_v17 = vpop.permute.xlu0 %251  ;;  %1318 = vmatprep.subr.mxu1 %v349_v15 }
 0x165   :  { %1311 = vmatprep.subr.mxu0 %v252_v17  ;;  %1319 = vmatpush3.msra.mxu1 %v349_v15 }
 0x166   :  { %1312 = vmatpush3.msra.mxu0 %v252_v17  ;;  %1321 = vmatmul.mubr.msk.f32.vlgmr.msra.gmra.mxu1 %vm76_vm0, %v1571_v16 }
 0x167   :  { %1314 = vmatmul.mubr.msk.f32.vlgmr.msra.gmra.mxu0 %vm76_vm0, %v1573_v18  ;;  %1338 = vmatprep.mubr.msk.f32.mxu1 %vm76_vm0, %v1548_v4 }
 0x168   :  { %1323 = vmatprep.subr.mxu0 %v451_v25 }
 0x169   :  { %1324 = vmatpush3.msra.mxu0 %v451_v25 }
 0x16a   :  { %1325 = vmatprep.subr.mxu0 %v450_v26 }
 0x16b   :  { %1326 = vmatpush3.msra.mxu0 %v450_v26 }
 0x16c   :  { %1327 = vmatprep.subr.mxu0 %v449_v27 }
 0x16d   :  { %1328 = vmatpush3.msra.mxu0 %v449_v27 }
 0x16e   :  { %1329 = vmatprep.subr.mxu0 %v448_v40 }
 0x16f   :  { %1330 = vmatpush3.msra.mxu0 %v448_v40 }
 0x1b2   :  { %v1308_v19 = vpop.f32.mrf.mxu1 }
 0x1b3   :  { %243 = vrot.lane.b32.xlu1 %v1308_v19, %s1500_s6 }
 0x1b4   :  { %v230_v20 = vpop.f32.mrf.mxu1 }
 0x1b5   :  { %241 = vrot.lane.b32.xlu0 %v230_v20, %s1500_s6 }
 0x225   :  { %v244_v28 = vpop.permute.xlu1 %243 }
 0x226   :  { %v1322_v23 = vpop.f32.mrf.mxu1  ;;  %v248_v31 = vadd.f32 %v244_v28, %v155_v8 }
 0x227   :  { %v1315_v21 = vpop.f32.mrf.mxu0  ;;  %v242_v29 = vpop.permute.xlu0 %241 }
 0x228   :  { %342 = vrot.lane.b32.xlu1 %v1315_v21, %s1500_s6  ;;  %v426_v24 = vpop.f32.mrf.mxu1  ;;  %v247_v33 = vadd.f32 %v242_v29, %v150_v10  ;;  %v1234_v21 = vld [vmem:[%s1656_s3 + $0x2] ss:$0 sm:$0xff]  ;;  %s1502_s3 = smov [#allocation8]  }
 0x229   :  { %v329_v22 = vpop.f32.mrf.mxu0  ;;  %s1201_s12 = sshll.u32 %s1502_s3, 4  ;;  %s1202_s12 = int_to_ptr.vmem [resolvable:$true] %s1201_s12 }
 0x22a   :  { %340 = vrot.lane.b32.xlu0 %v329_v22, %s1500_s6  ;;  %s1468_s13 = scalar_lea.vmem %s1202_s12, 256  ;;  %p1473_p2 = scmp.lt.s32.totalorder %s1202_s12, %s1202_s12 }
 0x22b   :  { %p1469_p1 = scmp.ne.s32.totalorder %s1202_s12, %s1468_s13  ;;  %p1474_p3 = scmp.lt.s32.totalorder %s1468_s13, %s1468_s13 }
 0x22c   :  { %439 = vrot.lane.b32.xlu1 %v1322_v23, %s1500_s6 }
 0x22d   :  { %p1475_p4 = por %p1474_p3, %p1473_p2 }
 0x22e   :  { %437 = vrot.lane.b32.xlu0 %v426_v24, %s1500_s6 }
 0x22f   :  { %p1476_p5 = pnand %p1475_p4, %p1469_p1 }
 0x29a   :  { %v343_v30 = vpop.permute.xlu1 %342 }
 0x29b   :  { %v347_v34 = vadd.f32 %v343_v30, %v248_v31 }
 0x29c   :  { %v341_v32 = vpop.permute.xlu0 %340 }
 0x29d   :  { %v346_v36 = vadd.f32 %v341_v32, %v247_v33 }
 0x29e   :  { %v440_v35 = vpop.permute.xlu1 %439 }
 0x29f   :  { %v444_v37 = vadd.f32 %v440_v35, %v347_v34 }
 0x2a0   :  { %v438_v38 = vpop.permute.xlu0 %437 }
 0x2a1   :  { %1396 = vtanh.f32 %v444_v37  ;;  %v443_v39 = vadd.f32 %v438_v38, %v346_v36 }
 0x2a3   :  { %1398 = vtanh.f32 %v443_v39 }
 0x2ae   :  { %v1397_v41 = vpop.eup %1396 }
 0x2af   :  { %464 = vrot.lane.b32.xlu1 %v1397_v41, %s1501_s7 }
 0x2b0   :  { %v1399_v42 = vpop.eup %1398 }
 0x2b1   :  { %462 = vrot.lane.b32.xlu0 %v1399_v42, %s1501_s7 }
 0x321   :  { %v465_v44 = vpop.permute.xlu1 %464 }
 0x323   :  { %v463_v43 = vpop.permute.xlu0 %462 }
 0x324   :  { %1331 = vmatprep.mubr.msk.f32.mxu0 %vm466_vm1, %v463_v43 }
 0x325   :  { %1332 = vmatmul.mubr.msk.f32.vlgmr.msra.gmra.mxu0 %vm466_vm1, %v465_v44 }
 0x326   :  { %1352 = vmatprep.mubr.msk.f32.mxu0 %vm76_vm0, %v1563_v12 }
 0x3e5   :  { %v1333_v46 = vpop.f32.mrf.mxu0 }
 0x3e6   :  { %v543_v47 = vadd.f32 %v1333_v46, %v1224_v45 }
 0x3e7   :  { %v537_v48 = vpop.f32.mrf.mxu0 }
 0x3e8   :  { %v538_v49 = vadd.f32 %v1224_v45, %v537_v48  ;;  %635 = vrot.lane.b32.xlu0 %v543_v47, %s1500_s6  ;;  %1334 = vmatprep.subr.mxu1 %v543_v47 }
 0x3e9   :  { %1335 = vmatpush3.msra.mxu1 %v543_v47 }
 0x3ea   :  { %633 = vrot.lane.b32.xlu1 %v538_v49, %s1500_s6  ;;  %1336 = vmatprep.subr.mxu1 %v538_v49 }
 0x3eb   :  { %1337 = vmatpush3.msra.mxu1 %v538_v49 }
 0x3ec   :  { %726 = vrot.lane.b32.xlu0 %v543_v47, %s1499_s5  ;;  %1339 = vmatmul.mubr.msk.f32.vlgmr.msra.gmra.mxu1 %vm76_vm0, %v1561_v11 }
 0x3ed   :  { %1345 = vmatprep.mubr.msk.f32.mxu1 %vm76_vm0, %v1552_v5 }
 0x3ee   :  { %724 = vrot.lane.b32.xlu1 %v538_v49, %s1499_s5 }
 0x45a   :  { %v636_v50 = vpop.permute.xlu0 %635 }
 0x45b   :  { %1341 = vmatprep.subr.mxu1 %v636_v50 }
 0x45c   :  { %v634_v51 = vpop.permute.xlu1 %633  ;;  %1342 = vmatpush3.msra.mxu1 %v636_v50 }
 0x45d   :  { %1343 = vmatprep.subr.mxu1 %v634_v51 }
 0x45e   :  { %v727_v52 = vpop.permute.xlu0 %726  ;;  %1344 = vmatpush3.msra.mxu1 %v634_v51 }
 0x45f   :  { %1346 = vmatmul.mubr.msk.f32.vlgmr.msra.gmra.mxu1 %vm76_vm0, %v1573_v18  ;;  %1348 = vmatprep.subr.mxu0 %v727_v52 }
 0x460   :  { %1349 = vmatpush3.msra.mxu0 %v727_v52  ;;  %v725_v53 = vpop.permute.xlu1 %724  ;;  %1355 = vmatprep.subr.mxu1 %v821_v60 }
 0x461   :  { %1350 = vmatprep.subr.mxu0 %v725_v53  ;;  %1356 = vmatpush3.msra.mxu1 %v821_v60 }
 0x462   :  { %1351 = vmatpush3.msra.mxu0 %v725_v53  ;;  %1357 = vmatprep.subr.mxu1 %v820_v61 }
 0x463   :  { %1353 = vmatmul.mubr.msk.f32.vlgmr.msra.gmra.mxu0 %vm76_vm0, %v1571_v16  ;;  %1358 = vmatpush3.msra.mxu1 %v820_v61 }
 0x464   :  { %1370 = vmatprep.mubr.msk.f32.mxu0 %vm76_vm0, %v1548_v4  ;;  %1359 = vmatprep.subr.mxu1 %v819_v62 }
 0x465   :  { %1360 = vmatpush3.msra.mxu1 %v819_v62 }
 0x466   :  { %1361 = vmatprep.subr.mxu1 %v818_v14 }
 0x467   :  { %1362 = vmatpush3.msra.mxu1 %v818_v14 }
 0x4ac   :  { %v1340_v54 = vpop.f32.mrf.mxu1 }
 0x4ad   :  { %625 = vrot.lane.b32.xlu1 %v1340_v54, %s1500_s6 }
 0x4ae   :  { %v612_v55 = vpop.f32.mrf.mxu1 }
 0x4af   :  { %623 = vrot.lane.b32.xlu0 %v612_v55, %s1500_s6 }
 0x51f   :  { %v1347_v56 = vpop.f32.mrf.mxu1  ;;  %v626_v63 = vpop.permute.xlu1 %625 }
 0x520   :  { %718 = vrot.lane.b32.xlu1 %v1347_v56, %s1500_s6  ;;  %v630_v2 = vadd.f32 %v626_v63, %v543_v47 }
 0x521   :  { %v705_v57 = vpop.f32.mrf.mxu1  ;;  %v624_v0 = vpop.permute.xlu0 %623 }
 0x522   :  { %716 = vrot.lane.b32.xlu0 %v705_v57, %s1500_s6  ;;  %v629_v4 = vadd.f32 %v624_v0, %v538_v49 }
 0x523   :  { %v1354_v58 = vpop.f32.mrf.mxu0 }
 0x524   :  { %809 = vrot.lane.b32.xlu1 %v1354_v58, %s1500_s6 }
 0x525   :  { %v796_v59 = vpop.f32.mrf.mxu0 }
 0x526   :  { %807 = vrot.lane.b32.xlu0 %v796_v59, %s1500_s6 }
 0x592   :  { %v719_v1 = vpop.permute.xlu1 %718 }
 0x593   :  { %v723_v6 = vadd.f32 %v719_v1, %v630_v2 }
 0x594   :  { %v717_v3 = vpop.permute.xlu0 %716 }
 0x595   :  { %v722_v8 = vadd.f32 %v717_v3, %v629_v4 }
 0x596   :  { %v810_v7 = vpop.permute.xlu1 %809 }
 0x597   :  { %v814_v9 = vadd.f32 %v810_v7, %v723_v6 }
 0x598   :  { %v808_v10 = vpop.permute.xlu0 %807 }
 0x599   :  { %1400 = vtanh.f32 %v814_v9  ;;  %v813_v13 = vadd.f32 %v808_v10, %v722_v8 }
 0x59b   :  { %1402 = vtanh.f32 %v813_v13 }
 0x5a6   :  { %v1401_v15 = vpop.eup %1400 }
 0x5a7   :  { %834 = vrot.lane.b32.xlu1 %v1401_v15, %s1501_s7 }
 0x5a8   :  { %v1403_v17 = vpop.eup %1402 }
 0x5a9   :  { %832 = vrot.lane.b32.xlu0 %v1403_v17, %s1501_s7 }
 0x619   :  { %v835_v20 = vpop.permute.xlu1 %834 }
 0x61b   :  { %v833_v19 = vpop.permute.xlu0 %832 }
 0x61c   :  { %1363 = vmatprep.mubr.msk.f32.mxu1 %vm466_vm1, %v833_v19 }
 0x61d   :  { %1364 = vmatmul.mubr.msk.f32.vlgmr.msra.gmra.mxu1 %vm466_vm1, %v835_v20 }
 0x61e   :  { %1384 = vmatprep.mubr.msk.f32.mxu1 %vm76_vm0, %v1563_v12 }
 0x6dd   :  { %v1365_v22 = vpop.f32.mrf.mxu1 }
 0x6de   :  { %v912_v23 = vadd.f32 %v1365_v22, %v1234_v21 }
 0x6df   :  { %v906_v24 = vpop.f32.mrf.mxu1 }
 0x6e0   :  { %v907_v25 = vadd.f32 %v1234_v21, %v906_v24  ;;  %1004 = vrot.lane.b32.xlu0 %v912_v23, %s1500_s6  ;;  %1366 = vmatprep.subr.mxu0 %v912_v23 }
 0x6e1   :  { %1367 = vmatpush3.msra.mxu0 %v912_v23 }
 0x6e2   :  { %1002 = vrot.lane.b32.xlu1 %v907_v25, %s1500_s6  ;;  %1368 = vmatprep.subr.mxu0 %v907_v25 }
 0x6e3   :  { %1369 = vmatpush3.msra.mxu0 %v907_v25 }
 0x6e4   :  { %1095 = vrot.lane.b32.xlu0 %v912_v23, %s1499_s5  ;;  %1371 = vmatmul.mubr.msk.f32.vlgmr.msra.gmra.mxu0 %vm76_vm0, %v1561_v11 }
 0x6e5   :  { %1377 = vmatprep.mubr.msk.f32.mxu0 %vm76_vm0, %v1552_v5 }
 0x6e6   :  { %1093 = vrot.lane.b32.xlu1 %v907_v25, %s1499_s5 }
 0x752   :  { %v1005_v12 = vpop.permute.xlu0 %1004 }
 0x753   :  { %1373 = vmatprep.subr.mxu0 %v1005_v12 }
 0x754   :  { %v1003_v26 = vpop.permute.xlu1 %1002  ;;  %1374 = vmatpush3.msra.mxu0 %v1005_v12 }
 0x755   :  { %1375 = vmatprep.subr.mxu0 %v1003_v26 }
 0x756   :  { %v1096_v27 = vpop.permute.xlu0 %1095  ;;  %1376 = vmatpush3.msra.mxu0 %v1003_v26 }
 0x757   :  { %1378 = vmatmul.mubr.msk.f32.vlgmr.msra.gmra.mxu0 %vm76_vm0, %v1573_v18  ;;  %1380 = vmatprep.subr.mxu1 %v1096_v27 }
 0x758   :  { %1381 = vmatpush3.msra.mxu1 %v1096_v27  ;;  %v1094_v28 = vpop.permute.xlu1 %1093 }
 0x759   :  { %1382 = vmatprep.subr.mxu1 %v1094_v28 }
 0x75a   :  { %1383 = vmatpush3.msra.mxu1 %v1094_v28 }
 0x75b   :  { %1385 = vmatmul.mubr.msk.f32.vlgmr.msra.gmra.mxu1 %vm76_vm0, %v1571_v16 }
 0x7a4   :  { %v1372_v5 = vpop.f32.mrf.mxu0 }
 0x7a5   :  { %994 = vrot.lane.b32.xlu1 %v1372_v5, %s1500_s6 }
 0x7a6   :  { %v981_v11 = vpop.f32.mrf.mxu0 }
 0x7a7   :  { %992 = vrot.lane.b32.xlu0 %v981_v11, %s1500_s6 }
 0x817   :  { %v1379_v29 = vpop.f32.mrf.mxu0  ;;  %v995_v32 = vpop.permute.xlu1 %994 }
 0x818   :  { %1087 = vrot.lane.b32.xlu1 %v1379_v29, %s1500_s6  ;;  %v999_v34 = vadd.f32 %v995_v32, %v912_v23 }
 0x819   :  { %v1074_v30 = vpop.f32.mrf.mxu0  ;;  %v993_v16 = vpop.permute.xlu0 %992 }
 0x81a   :  { %1085 = vrot.lane.b32.xlu0 %v1074_v30, %s1500_s6  ;;  %v998_v36 = vadd.f32 %v993_v16, %v907_v25 }
 0x81b   :  { %v1386_v18 = vpop.f32.mrf.mxu1 }
 0x81c   :  { %1178 = vrot.lane.b32.xlu1 %v1386_v18, %s1500_s6 }
 0x81d   :  { %v1165_v31 = vpop.f32.mrf.mxu1 }
 0x81e   :  { %1176 = vrot.lane.b32.xlu0 %v1165_v31, %s1500_s6 }
 0x88a   :  { %v1088_v33 = vpop.permute.xlu1 %1087 }
 0x88b   :  { %v1092_v37 = vadd.f32 %v1088_v33, %v999_v34 }
 0x88c   :  { %v1086_v35 = vpop.permute.xlu0 %1085 }
 0x88d   :  { %v1091_v39 = vadd.f32 %v1086_v35, %v998_v36 }
 0x88e   :  { %v1179_v38 = vpop.permute.xlu1 %1178 }
 0x88f   :  { %v1183_v40 = vadd.f32 %v1179_v38, %v1092_v37 }
 0x890   :  { %v1177_v41 = vpop.permute.xlu0 %1176 }
 0x891   :  { %1404 = vtanh.f32 %v1183_v40  ;;  %v1182_v42 = vadd.f32 %v1177_v41, %v1091_v39 }
 0x893   :  { %1406 = vtanh.f32 %v1182_v42 }
 0x89e   :  { %v1405_v43 = vpop.eup %1404 }
 0x89f   :  { %1190 = vrot.lane.b32.xlu1 %v1405_v43, %s1501_s7 }
 0x8a0   :  { %v1407_v44 = vpop.eup %1406 }
 0x8a1   :  { %1188 = vrot.lane.b32.xlu0 %v1407_v44, %s1501_s7 }
 0x911   :  { %v1191_v45 = vpop.permute.xlu1 %1190 }
 0x912   :  { %1195 = vst.msk [vmem:[#allocation8 + $0x8] sm:$0xff] %vm466_vm1, %v1191_v45 }
 0x913   :  { %v1189_v46 = vpop.permute.xlu0 %1188 }
 0x914   :  { %1194 = vst.msk [vmem:[#allocation8] sm:$0xff] %vm466_vm1, %v1189_v46 }
 0x915   :  { %1479 = shalt.err (!%p1476_p5)
}
 0x916   :  { %1207 = dma.vmem_to_hbm [thread:$0]  %s1202_s12, 256, %s1657_s4, [#allocation4], %s1496_s20, %s1496_s20, %s1497_s21  }
 0x917   :  { %1492 = dma.done.wait [#allocation4], 256  }
 0x918   :  { %1493 = vsyncadd [#allocation4], 4294967040 }
 0x919   :  { %1211 = vsyncpa [#allocation3], 1 }
 0x91a   :  { %1212 = vsyncpa [#allocation6], 1 }
 0x91b   :  { %1213 = vsyncpa [#allocation4], 1 }

</bundles_post_ra>
